<compile_context>
chip_gen: v6e
topology: v6e:2x2x1
jax: 0.10.0
libtpu: 0.0.40
codegen_flags: <defaults>
</compile_context>

<pallas_src>
import math

import numpy as np
import jax
import jax.numpy as jnp
from jax.experimental import pallas as pl
from jax.experimental.pallas import tpu as pltpu


# ----------------------------- Pallas kernel --------------------------------

def _make_decoder_kernel(acts):
    """One kernel for the whole decoder: chained matmul + shift + activation."""
    n_layers = len(acts)

    def kernel(*refs):
        x_ref = refs[0]
        o_ref = refs[-1]
        layer_refs = refs[1:-1]
        a = x_ref[...].astype(jnp.bfloat16)                 # (N, Cin0)
        for i, act in enumerate(acts):
            t_ref = layer_refs[2 * i]                        # (CinHW, CoutHoWo) bf16
            s_ref = layer_refs[2 * i + 1]                    # (1, CoutHoWo) f32
            z = jnp.dot(a, t_ref[...], preferred_element_type=jnp.float32)
            z = z + s_ref[...]                               # folded-BN shift
            if act == "leaky_relu":
                y = jnp.where(z > 0, z, 0.2 * z)
            else:                                            # "tanh"
                y = jnp.tanh(z)
            if i < n_layers - 1:
                a = y.astype(jnp.bfloat16)                   # stays on-chip
            else:
                o_ref[...] = y

    return kernel


def decoder_forward_pallas(x, operands, acts, out_meta):
    """x: (N, latent, 1, 1) NCHW -> (N, img_channels, Hout, Wout)."""
    N = x.shape[0]
    x_mat = x.reshape(N, -1)                                 # (N, Cin0*1*1)

    flat_args = []
    in_specs = [pl.BlockSpec(x_mat.shape, lambda i: (0, 0))]
    for (t, s) in operands:
        flat_args += [t, s]
        in_specs += [pl.BlockSpec(t.shape, lambda i: (0, 0)),
                     pl.BlockSpec(s.shape, lambda i: (0, 0))]

    cout, hout, wout = out_meta
    m_out = cout * hout * wout
    out = pl.pallas_call(
        _make_decoder_kernel(acts),
        out_shape=jax.ShapeDtypeStruct((N, m_out), jnp.float32),
        grid_spec=pl.GridSpec(
            grid=(1,),
            in_specs=in_specs,
            out_specs=pl.BlockSpec((N, m_out), lambda i: (0, 0)),
        ),
        compiler_params=pltpu.CompilerParams(
            dimension_semantics=("arbitrary",)),
    )(x_mat, *flat_args)
    # Columns are ordered (co, oy, ox) -> free metadata reshape to NCHW.
    return out.reshape(N, cout, hout, wout)


# --------------------- host-side operator construction -----------------------

def _convt_operator(w, H, W, stride, pad):
    """Dense linear operator of ConvTranspose2d(kernel=KxK, no bias).

    T[ci*H*W + h*W + w, co*Ho*Wo + oy*Wo + ox] = weight[ci, co, kh, kw]
    with oy = stride*h + kh - pad, ox = stride*w + kw - pad (0 elsewhere).
    """
    w = np.asarray(w, np.float32)
    Cin, Cout, K, _ = w.shape
    Ho = (H - 1) * stride - 2 * pad + K
    Wo = (W - 1) * stride - 2 * pad + K
    T = np.zeros((Cin, H, W, Cout, Ho, Wo), np.float32)
    for h in range(H):
        for ww in range(W):
            for kh in range(K):
                for kw in range(K):
                    oy = stride * h + kh - pad
                    ox = stride * ww + kw - pad
                    if 0 <= oy < Ho and 0 <= ox < Wo:
                        T[:, h, ww, :, oy, ox] = w[:, :, kh, kw]
    return T.reshape(Cin * H * W, Cout * Ho * Wo), Ho, Wo


def build_decoder_params(key, img_size, latent_vec_size, img_channels, n_features):
    """Mirror Decoder.__init__ structure; deterministic synthetic weights."""
    cfgs = []
    exp_factor = math.ceil(math.log(min(img_size) // 2, 2)) - 2
    n_in = n_features * 2 ** exp_factor
    cfgs.append(dict(cin=latent_vec_size, cout=n_in, stride=1, pad=0,
                     bn=True, act="leaky_relu"))
    pyramid_dim = min(*img_size) // 2
    while pyramid_dim > 4:
        cfgs.append(dict(cin=n_in, cout=n_in // 2, stride=2, pad=1,
                         bn=True, act="leaky_relu"))
        n_in //= 2
        pyramid_dim //= 2
    cfgs.append(dict(cin=n_in, cout=img_channels, stride=2, pad=1,
                     bn=False, act="tanh"))

    params = []
    for cfg in cfgs:
        key, k1, k2, k3, k4, k5 = jax.random.split(key, 6)
        p = dict(cfg)
        cin, cout = cfg["cin"], cfg["cout"]
        p["w"] = 0.05 * jax.random.normal(k1, (cin, cout, 4, 4), jnp.float32)
        if cfg["bn"]:
            p["gamma"] = 1.0 + 0.1 * jax.random.normal(k2, (cout,), jnp.float32)
            p["beta"] = 0.05 * jax.random.normal(k3, (cout,), jnp.float32)
            p["mean"] = 0.1 * jax.random.normal(k4, (cout,), jnp.float32)
            p["var"] = jax.random.uniform(k5, (cout,), jnp.float32, 0.5, 1.5)
        params.append(p)
    return params


def build_kernel_operands(params, in_hw=(1, 1)):
    """Fold each ConvTranspose2d + eval-BN into one bf16 matrix + f32 shift row."""
    operands, acts = [], []
    H, W = in_hw
    for p in params:
        cout = p["cout"]
        T, Ho, Wo = _convt_operator(p["w"], H, W, p["stride"], p["pad"])
        if p["bn"]:
            inv = np.asarray(p["gamma"]) / np.sqrt(np.asarray(p["var"]) + 1e-5)
            shift = np.asarray(p["beta"]) - np.asarray(p["mean"]) * inv
        else:
            inv = np.ones((cout,), np.float32)
            shift = np.zeros((cout,), np.float32)
        # Fold the BN scale into the operator's output columns (per channel co).
        T = (T.reshape(-1, cout, Ho * Wo) * inv[None, :, None]).reshape(T.shape)
        s_vec = np.repeat(shift.astype(np.float32), Ho * Wo)[None, :]
        operands.append((jnp.asarray(T, jnp.bfloat16),
                         jnp.asarray(s_vec, jnp.float32)))
        acts.append(p["act"])
        H, W = Ho, Wo
    out_meta = (params[-1]["cout"], H, W)
    return operands, acts, out_meta


# ------------------------------- pure-JAX reference --------------------------

def _convt_ref(x, w, stride, pad):
    K = w.shape[2]
    rhs = jnp.transpose(jnp.flip(w, (2, 3)), (1, 0, 2, 3))       # OIHW
    return jax.lax.conv_general_dilated(
        x, rhs, window_strides=(1, 1),
        padding=[(K - 1 - pad, K - 1 - pad)] * 2,
        lhs_dilation=(stride, stride),
        dimension_numbers=("NCHW", "OIHW", "NCHW"))


def decoder_forward_ref(x, params):
    y = x
    for p in params:
        y = _convt_ref(y, p["w"], p["stride"], p["pad"])
        if p["bn"]:
            m = p["mean"][None, :, None, None]
            v = p["var"][None, :, None, None]
            g = p["gamma"][None, :, None, None]
            b = p["beta"][None, :, None, None]
            y = (y - m) / jnp.sqrt(v + 1e-5) * g + b
        if p["act"] == "leaky_relu":
            y = jnp.where(y > 0, y, 0.2 * y)
        else:
            y = jnp.tanh(y)
    return y


# ------------------------------------ main -----------------------------------

if __name__ == "__main__":
    img_size = (16, 16)
    latent_vec_size = 8
    img_channels = 3
    n_features = 4
    batch = 2

    key = jax.random.PRNGKey(0)
    kx, kp = jax.random.split(key)
    # Decoder input is the latent code: (N, latent_vec_size, 1, 1), NCHW.
    x = jax.random.normal(kx, (batch, latent_vec_size, 1, 1), jnp.float32)
    params = build_decoder_params(kp, img_size, latent_vec_size,
                                  img_channels, n_features)
    operands, acts, out_meta = build_kernel_operands(params)

    # Operands passed as jit arguments (not baked constants) -> no recompile on
    # weight updates.
    fwd = jax.jit(lambda inp, ops: decoder_forward_pallas(inp, ops, acts, out_meta))
    out = jax.block_until_ready(fwd(x, operands))
    assert out.shape == (batch, img_channels, img_size[0], img_size[1]), out.shape

    ref = jax.block_until_ready(decoder_forward_ref(x, params))
    # bf16 matmul operands (f32 accumulation) -> relaxed tolerance vs f32 ref.
    np.testing.assert_allclose(np.asarray(out), np.asarray(ref),
                               rtol=2e-2, atol=2e-2)
    print("KERNEL_OK")
</pallas_src>

<mosaic_0001>
module attributes {stable_mosaic.version = 11 : i64} {
  func.func @kernel(%arg0: i32, %arg1: memref<2x8xf32, #tpu.memory_space<vmem>>, %arg2: memref<8x128xbf16, #tpu.memory_space<vmem>>, %arg3: memref<1x128xf32, #tpu.memory_space<vmem>>, %arg4: memref<128x256xbf16, #tpu.memory_space<vmem>>, %arg5: memref<1x256xf32, #tpu.memory_space<vmem>>, %arg6: memref<256x768xbf16, #tpu.memory_space<vmem>>, %arg7: memref<1x768xf32, #tpu.memory_space<vmem>>, %arg8: memref<2x768xf32, #tpu.memory_space<vmem>>) attributes {dimension_semantics = [#tpu.dimension_semantics<arbitrary>], iteration_bounds = array<i64: 1>, scalar_prefetch = 0 : i64, scratch_operands = 0 : i64, tpu.core_type = #tpu.core_type<tc>, window_params = [{pipeline_mode = #tpu.pipeline_mode<synchronous>, transform_indices = @transform_0, window_bounds = array<i64: 2, 8>}, {pipeline_mode = #tpu.pipeline_mode<synchronous>, transform_indices = @transform_1, window_bounds = array<i64: 8, 128>}, {pipeline_mode = #tpu.pipeline_mode<synchronous>, transform_indices = @transform_2, window_bounds = array<i64: 1, 128>}, {pipeline_mode = #tpu.pipeline_mode<synchronous>, transform_indices = @transform_3, window_bounds = array<i64: 128, 256>}, {pipeline_mode = #tpu.pipeline_mode<synchronous>, transform_indices = @transform_4, window_bounds = array<i64: 1, 256>}, {pipeline_mode = #tpu.pipeline_mode<synchronous>, transform_indices = @transform_5, window_bounds = array<i64: 256, 768>}, {pipeline_mode = #tpu.pipeline_mode<synchronous>, transform_indices = @transform_6, window_bounds = array<i64: 1, 768>}, {pipeline_mode = #tpu.pipeline_mode<synchronous>, transform_indices = @transform_7, window_bounds = array<i64: 2, 768>}]} {
    %c0 = arith.constant 0 : index
    %c0_0 = arith.constant 0 : index
    %0 = vector.load %arg1[%c0, %c0_0] : memref<2x8xf32, #tpu.memory_space<vmem>>, vector<2x8xf32>
    %1 = arith.truncf %0 : vector<2x8xf32> to vector<2x8xbf16>
    %c0_1 = arith.constant 0 : index
    %c0_2 = arith.constant 0 : index
    %2 = vector.load %arg2[%c0_1, %c0_2] : memref<8x128xbf16, #tpu.memory_space<vmem>>, vector<8x128xbf16>
    %cst = arith.constant dense<0.000000e+00> : vector<2x128xf32>
    %3 = tpu.matmul %1, %2, %cst {dimension_numbers = #tpu.dot_dimension_numbers<[1], [0], [0], [1], [0, 0, 1, 1], [], []>} : vector<2x8xbf16>, vector<8x128xbf16>, vector<2x128xf32> -> vector<2x128xf32>
    %c0_3 = arith.constant 0 : index
    %c0_4 = arith.constant 0 : index
    %4 = vector.load %arg3[%c0_3, %c0_4] : memref<1x128xf32, #tpu.memory_space<vmem>>, vector<1x128xf32>
    %5 = vector.broadcast %4 : vector<1x128xf32> to vector<2x128xf32>
    %6 = arith.addf %3, %5 : vector<2x128xf32>
    %cst_5 = arith.constant 0.000000e+00 : f32
    %7 = vector.broadcast %cst_5 : f32 to vector<2x128xf32>
    %8 = arith.cmpf ogt, %6, %7 : vector<2x128xf32>
    %cst_6 = arith.constant 2.000000e-01 : f32
    %9 = vector.broadcast %cst_6 : f32 to vector<2x128xf32>
    %10 = arith.mulf %9, %6 : vector<2x128xf32>
    %11 = arith.select %8, %6, %10 : vector<2x128xi1>, vector<2x128xf32>
    %12 = arith.truncf %11 : vector<2x128xf32> to vector<2x128xbf16>
    %c0_7 = arith.constant 0 : index
    %c0_8 = arith.constant 0 : index
    %13 = vector.load %arg4[%c0_7, %c0_8] : memref<128x256xbf16, #tpu.memory_space<vmem>>, vector<128x256xbf16>
    %cst_9 = arith.constant dense<0.000000e+00> : vector<2x256xf32>
    %14 = tpu.matmul %12, %13, %cst_9 {dimension_numbers = #tpu.dot_dimension_numbers<[1], [0], [0], [1], [0, 0, 1, 1], [], []>} : vector<2x128xbf16>, vector<128x256xbf16>, vector<2x256xf32> -> vector<2x256xf32>
    %c0_10 = arith.constant 0 : index
    %c0_11 = arith.constant 0 : index
    %15 = vector.load %arg5[%c0_10, %c0_11] : memref<1x256xf32, #tpu.memory_space<vmem>>, vector<1x256xf32>
    %16 = vector.broadcast %15 : vector<1x256xf32> to vector<2x256xf32>
    %17 = arith.addf %14, %16 : vector<2x256xf32>
    %cst_12 = arith.constant 0.000000e+00 : f32
    %18 = vector.broadcast %cst_12 : f32 to vector<2x256xf32>
    %19 = arith.cmpf ogt, %17, %18 : vector<2x256xf32>
    %cst_13 = arith.constant 2.000000e-01 : f32
    %20 = vector.broadcast %cst_13 : f32 to vector<2x256xf32>
    %21 = arith.mulf %20, %17 : vector<2x256xf32>
    %22 = arith.select %19, %17, %21 : vector<2x256xi1>, vector<2x256xf32>
    %23 = arith.truncf %22 : vector<2x256xf32> to vector<2x256xbf16>
    %c0_14 = arith.constant 0 : index
    %c0_15 = arith.constant 0 : index
    %24 = vector.load %arg6[%c0_14, %c0_15] : memref<256x768xbf16, #tpu.memory_space<vmem>>, vector<256x768xbf16>
    %cst_16 = arith.constant dense<0.000000e+00> : vector<2x768xf32>
    %25 = tpu.matmul %23, %24, %cst_16 {dimension_numbers = #tpu.dot_dimension_numbers<[1], [0], [0], [1], [0, 0, 1, 1], [], []>} : vector<2x256xbf16>, vector<256x768xbf16>, vector<2x768xf32> -> vector<2x768xf32>
    %c0_17 = arith.constant 0 : index
    %c0_18 = arith.constant 0 : index
    %26 = vector.load %arg7[%c0_17, %c0_18] : memref<1x768xf32, #tpu.memory_space<vmem>>, vector<1x768xf32>
    %27 = vector.broadcast %26 : vector<1x768xf32> to vector<2x768xf32>
    %28 = arith.addf %25, %27 : vector<2x768xf32>
    %29 = math.tanh %28 : vector<2x768xf32>
    %c0_19 = arith.constant 0 : index
    %c0_20 = arith.constant 0 : index
    %30 = vector.load %arg8[%c0_19, %c0_20] : memref<2x768xf32, #tpu.memory_space<vmem>>, vector<2x768xf32>
    tpu.vector_store %arg8[%c0_19, %c0_20], %29 {strides = array<i32>} : memref<2x768xf32, #tpu.memory_space<vmem>>, vector<2x768xf32>,
    return
  }
  func.func @transform_0(%arg0: i32) -> (i32, i32) {
    %c0_i32 = arith.constant 0 : i32
    %c0_i32_0 = arith.constant 0 : i32
    %c0_i32_1 = arith.constant 0 : i32
    return %c0_i32, %c0_i32_0 : i32, i32
  }
  func.func @transform_1(%arg0: i32) -> (i32, i32) {
    %c0_i32 = arith.constant 0 : i32
    %c0_i32_0 = arith.constant 0 : i32
    %c0_i32_1 = arith.constant 0 : i32
    return %c0_i32, %c0_i32_0 : i32, i32
  }
  func.func @transform_2(%arg0: i32) -> (i32, i32) {
    %c0_i32 = arith.constant 0 : i32
    %c0_i32_0 = arith.constant 0 : i32
    %c0_i32_1 = arith.constant 0 : i32
    return %c0_i32, %c0_i32_0 : i32, i32
  }
  func.func @transform_3(%arg0: i32) -> (i32, i32) {
    %c0_i32 = arith.constant 0 : i32
    %c0_i32_0 = arith.constant 0 : i32
    %c0_i32_1 = arith.constant 0 : i32
    return %c0_i32, %c0_i32_0 : i32, i32
  }
  func.func @transform_4(%arg0: i32) -> (i32, i32) {
    %c0_i32 = arith.constant 0 : i32
    %c0_i32_0 = arith.constant 0 : i32
    %c0_i32_1 = arith.constant 0 : i32
    return %c0_i32, %c0_i32_0 : i32, i32
  }
  func.func @transform_5(%arg0: i32) -> (i32, i32) {
    %c0_i32 = arith.constant 0 : i32
    %c0_i32_0 = arith.constant 0 : i32
    %c0_i32_1 = arith.constant 0 : i32
    return %c0_i32, %c0_i32_0 : i32, i32
  }
  func.func @transform_6(%arg0: i32) -> (i32, i32) {
    %c0_i32 = arith.constant 0 : i32
    %c0_i32_0 = arith.constant 0 : i32
    %c0_i32_1 = arith.constant 0 : i32
    return %c0_i32, %c0_i32_0 : i32, i32
  }
  func.func @transform_7(%arg0: i32) -> (i32, i32) {
    %c0_i32 = arith.constant 0 : i32
    %c0_i32_0 = arith.constant 0 : i32
    %c0_i32_1 = arith.constant 0 : i32
    return %c0_i32, %c0_i32_0 : i32, i32
  }
}

</mosaic_0001>

<bundles_post_ra>
// kernel: _lambda_.1
= control target key start
LH: loop header
LB: loop body
LE: loop exit
PB: predicated region body
PF: predicated region fallthrough
CT: control target
= control target key end

     0   :  { %12 = vsyncpa [#allocation3], 0  ;;  %s1578_s0 = inlined_call_operand.hbm [shape: f32[2,8], index: 0, kind: input, shape index: {}]   ;;  %s1579_s1 = inlined_call_operand.hbm [shape: bf16[8,128], index: 1, kind: input, shape index: {}]   ;;  %s1580_s2 = inlined_call_operand.vmem [shape: f32[1,128], index: 2, kind: input, shape index: {}]   ;;  %s1581_s3 = inlined_call_operand.hbm [shape: bf16[128,256], index: 3, kind: input, shape index: {}]   ;;  %s1582_s4 = inlined_call_operand.vmem [shape: f32[1,256], index: 4, kind: input, shape index: {}]   ;;  %s1583_s5 = inlined_call_operand.hbm [shape: bf16[256,768], index: 5, kind: input, shape index: {}]   ;;  %s1584_s6 = inlined_call_operand.vmem [shape: f32[1,768], index: 6, kind: input, shape index: {}]   ;;  %s1585_s7 = inlined_call_operand.vmem [shape: f32[2,768], index: 7, kind: output, shape index: {}]  }
   0x1   :  { %13 = vsyncpa [#allocation5], 0 }
   0x2   :  { %14 = vsyncpa [#allocation8], 0  ;;  %s1477_s24 = smov [#allocation4]   ;;  %s1478_s26 = smov [#allocation2]  }
   0x3   :  { %s31_s25 = sshll.u32 %s1477_s24, 4  ;;  %s21_s27 = sshll.u32 %s1478_s26, 4  ;;  %s32_s25 = int_to_ptr.vmem [resolvable:$true] %s31_s25  ;;  %s22_s27 = int_to_ptr.vmem [resolvable:$true] %s21_s27 }
   0x4   :  { %s1399_s28 = scalar_lea.vmem %s32_s25, 64  ;;  %p1404_p1 = scmp.lt.s32.totalorder %s32_s25, %s32_s25 }
   0x5   :  { %p1400_p0 = scmp.ne.s32.totalorder %s32_s25, %s1399_s28  ;;  %p1405_p2 = scmp.lt.s32.totalorder %s1399_s28, %s1399_s28 }
   0x7   :  { %p1406_p3 = por %p1405_p2, %p1404_p1 }
   0x9   :  { %p1407_p4 = pnand %p1406_p3, %p1400_p0 }
   0xb   :  { %1410 = shalt.err (!%p1407_p4)
}
   0xc   :  { %34 = dma.hbm_to_vmem [thread:$0]  %s1579_s1, 64, %s32_s25, [#allocation5]  }
   0xd   :  { %s1419_s8 = scalar_lea.vmem %s22_s27, 32  ;;  %p1424_p6 = scmp.lt.s32.totalorder %s22_s27, %s22_s27 }
   0xe   :  { %p1420_p5 = scmp.ne.s32.totalorder %s22_s27, %s1419_s8  ;;  %p1425_p7 = scmp.lt.s32.totalorder %s1419_s8, %s1419_s8 }
  0x10   :  { %p1426_p8 = por %p1425_p7, %p1424_p6 }
  0x12   :  { %p1427_p9 = pnand %p1426_p8, %p1420_p5 }
  0x14   :  { %1430 = shalt.err (!%p1427_p9)
}
  0x15   :  { %24 = dma.hbm_to_vmem [thread:$0]  %s1578_s0, 32, %s22_s27, [#allocation3]  }
  0x16   :  { %s1479_s11 = smov [#allocation6]  }
  0x17   :  { %s42_s12 = sshll.u32 %s1479_s11, 4  ;;  %s43_s12 = int_to_ptr.vmem [resolvable:$true] %s42_s12 }
  0x18   :  { %s1439_s13 = scalar_lea.vmem %s43_s12, 2048  ;;  %p1444_p11 = scmp.lt.s32.totalorder %s43_s12, %s43_s12 }
  0x19   :  { %p1440_p10 = scmp.ne.s32.totalorder %s43_s12, %s1439_s13  ;;  %p1445_p12 = scmp.lt.s32.totalorder %s1439_s13, %s1439_s13 }
  0x1b   :  { %p1446_p13 = por %p1445_p12, %p1444_p11 }
  0x1d   :  { %p1447_p0 = pnand %p1446_p13, %p1440_p10 }
  0x1f   :  { %1450 = shalt.err (!%p1447_p0)
}
  0x20   :  { %s1480_s1 = smov 128   ;;  %s1481_s14 = smov 8  }
  0x21   :  { %48 = dma.hbm_to_vmem [thread:$0]  %s1581_s3, 2048, %s43_s12, [#allocation5], %s1480_s1, %s1480_s1, %s1481_s14  }
  0x22   :  { %s1482_s17 = smov [#allocation7]  }
  0x23   :  { %s56_s18 = sshll.u32 %s1482_s17, 4  ;;  %s57_s18 = int_to_ptr.vmem [resolvable:$true] %s56_s18 }
  0x24   :  { %s1459_s0 = scalar_lea.vmem %s57_s18, 12288  ;;  %p1464_p2 = scmp.lt.s32.totalorder %s57_s18, %s57_s18 }
  0x25   :  { %p1460_p1 = scmp.ne.s32.totalorder %s57_s18, %s1459_s0  ;;  %p1465_p3 = scmp.lt.s32.totalorder %s1459_s0, %s1459_s0 }
  0x27   :  { %p1466_p4 = por %p1465_p3, %p1464_p2 }
  0x29   :  { %p1467_p5 = pnand %p1466_p4, %p1460_p1 }
  0x2b   :  { %1470 = shalt.err (!%p1467_p5)
}
  0x2c   :  { %s1483_s19 = smov 384   ;;  %s1484_s20 = smov 24  }
  0x2d   :  { %62 = dma.hbm_to_vmem [thread:$0]  %s1583_s5, 12288, %s57_s18, [#allocation8], %s1483_s19, %s1483_s19, %s1484_s20  }
  0x2e   :  { %1471 = dma.done.wait [#allocation3], 32  }
  0x2f   :  { %1472 = vsyncadd [#allocation3], 4294967264 }
  0x30   :  { %1473 = dma.done.wait [#allocation5], 2112  }
  0x31   :  { %1474 = vsyncadd [#allocation5], 4294965184 }
  0x32   :  { %1475 = dma.done.wait [#allocation8], 12288  }
  0x33   :  { %1476 = vsyncadd [#allocation8], 4294955008  ;;  %v1485_v0 = vmov 0.0   ;;  %vm1486_vm0 = vmmov 0   ;;  %vm92_vm1 = vcmask 1043456   ;;  %vm88_vm2 = vcmask 64512  }
  0x34   :  { %1193 = vmatprep.subr.bf16.mxu1 %v1485_v0  ;;  %1195 = vmatprep.mubr.msk.bf16.mxu1 %vm1486_vm0, %v1485_v0  ;;  %v80_v1 = vld [vmem:[#allocation4] sm:$0xf]  ;;  %v78_v2 = vld [vmem:[#allocation2] sm:$0x3]  ;;  %v1216_v7 = vld [vmem:[#allocation6 + $0x64] ss:$8 sps:$4 sm:$0xff]  }
  0x35   :  { %v94_v3 = vsel %vm92_vm1, %v80_v1, 0  ;;  %v79_v4 = vpack.c.bf16 %v78_v2, %v78_v2  ;;  %v1213_v5 = vld [vmem:[#allocation6 + $0x74] ss:$8 sps:$4 sm:$0xff]   ;;  %v1211_v6 = vld [vmem:[#allocation6 + $0x70] ss:$8 sps:$4 sm:$0xff]   ;;  %v1487_v21 = vmov 0  }
  0x36   :  { %1194 = vmatpush3.bf16.msra.mxu1 %v94_v3  ;;  %v1214_v8 = vld [vmem:[#allocation6 + $0x60] ss:$8 sps:$4 sm:$0xff]   ;;  %v1219_v9 = vld [vmem:[#allocation6 + $0x54] ss:$8 sps:$4 sm:$0xff]   ;;  %v1217_v10 = vld [vmem:[#allocation6 + $0x50] ss:$8 sps:$4 sm:$0xff]  }
  0x37   :  { %248 = vmatprep.subr.bf16.mxu1 %v1213_v5  ;;  %v1222_v11 = vld [vmem:[#allocation6 + $0x44] ss:$8 sps:$4 sm:$0xff]   ;;  %v1220_v12 = vld [vmem:[#allocation6 + $0x40] ss:$8 sps:$4 sm:$0xff]   ;;  %v1225_v13 = vld [vmem:[#allocation6 + $0x34] ss:$8 sps:$4 sm:$0xff]  }
  0x38   :  { %v1223_v14 = vld [vmem:[#allocation6 + $0x30] ss:$8 sps:$4 sm:$0xff]   ;;  %v1228_v15 = vld [vmem:[#allocation6 + $0x24] ss:$8 sps:$4 sm:$0xff]   ;;  %v1226_v16 = vld [vmem:[#allocation6 + $0x20] ss:$8 sps:$4 sm:$0xff]  }
  0x39   :  { %1196 = vmatmul.mubr.msk.bf16.vlgmr.msra.gmra.mxu1 %vm88_vm2, %v79_v4  ;;  %v1231_v17 = vld [vmem:[#allocation6 + $0x14] ss:$8 sps:$4 sm:$0xff]   ;;  %v1229_v18 = vld [vmem:[#allocation6 + $0x10] ss:$8 sps:$4 sm:$0xff]   ;;  %v1234_v19 = vld [vmem:[#allocation6 + $0x4] ss:$8 sps:$4 sm:$0xff]  }
  0x3a   :  { %249 = vmatpush1.bf16.msra.mxu1 %v1211_v6  ;;  %v1232_v20 = vld [vmem:[#allocation6] ss:$8 sps:$4 sm:$0xff]   ;;  %280 = vmatprep.mubr.bf16.mxu1 %v1487_v21  ;;  %v1235_v22 = vld [vmem:[#allocation7 + $0x154] ss:$24 sps:$4 sm:$0xff]   ;;  %v1241_v25 = vld [vmem:[#allocation7 + $0x124] ss:$24 sps:$4 sm:$0xff]  }
  0x3b   :  { %250 = vmatprep.subr.bf16.mxu1 %v1216_v7  ;;  %v1237_v23 = vld [vmem:[#allocation7 + $0x150] ss:$24 sps:$4 sm:$0xff]   ;;  %v1240_v24 = vld [vmem:[#allocation7 + $0x15c] ss:$24 sps:$4 sm:$0xff]   ;;  %905 = vmatprep.subr.bf16.mxu0 %v1235_v22  ;;  %v1243_v26 = vld [vmem:[#allocation7 + $0x120] ss:$24 sps:$4 sm:$0xff]  }
  0x3c   :  { %906 = vmatpush1.bf16.msra.mxu0 %v1237_v23  ;;  %v1247_v27 = vld [vmem:[#allocation7 + $0xf4] ss:$24 sps:$4 sm:$0xff]   ;;  %v1249_v28 = vld [vmem:[#allocation7 + $0xf0] ss:$24 sps:$4 sm:$0xff]   ;;  %v1253_v29 = vld [vmem:[#allocation7 + $0xc4] ss:$24 sps:$4 sm:$0xff]  }
  0x3d   :  { %907 = vmatprep.subr.bf16.mxu0 %v1241_v25  ;;  %v1255_v30 = vld [vmem:[#allocation7 + $0xc0] ss:$24 sps:$4 sm:$0xff]   ;;  %v1259_v31 = vld [vmem:[#allocation7 + $0x94] ss:$24 sps:$4 sm:$0xff]   ;;  %v1261_v32 = vld [vmem:[#allocation7 + $0x90] ss:$24 sps:$4 sm:$0xff]  }
  0x3e   :  { %251 = vmatpush1.bf16.msra.mxu1 %v1214_v8  ;;  %v1265_v33 = vld [vmem:[#allocation7 + $0x64] ss:$24 sps:$4 sm:$0xff]   ;;  %v1267_v34 = vld [vmem:[#allocation7 + $0x60] ss:$24 sps:$4 sm:$0xff]   ;;  %v1271_v35 = vld [vmem:[#allocation7 + $0x34] ss:$24 sps:$4 sm:$0xff]  }
  0x3f   :  { %252 = vmatprep.subr.bf16.mxu1 %v1219_v9  ;;  %v1273_v36 = vld [vmem:[#allocation7 + $0x30] ss:$24 sps:$4 sm:$0xff]   ;;  %v1277_v37 = vld [vmem:[#allocation7 + $0x4] ss:$24 sps:$4 sm:$0xff]   ;;  %v1279_v38 = vld [vmem:[#allocation7] ss:$24 sps:$4 sm:$0xff]  }
  0x40   :  { %908 = vmatpush1.bf16.msra.mxu0 %v1243_v26  ;;  %v1283_v39 = vld [vmem:[#allocation7 + $0x2d4] ss:$24 sps:$4 sm:$0xff]   ;;  %v1285_v40 = vld [vmem:[#allocation7 + $0x2d0] ss:$24 sps:$4 sm:$0xff]   ;;  %v1289_v41 = vld [vmem:[#allocation7 + $0x2a4] ss:$24 sps:$4 sm:$0xff]  }
  0x41   :  { %909 = vmatprep.subr.bf16.mxu0 %v1247_v27  ;;  %v1291_v42 = vld [vmem:[#allocation7 + $0x2a0] ss:$24 sps:$4 sm:$0xff]   ;;  %v1295_v43 = vld [vmem:[#allocation7 + $0x274] ss:$24 sps:$4 sm:$0xff]   ;;  %v1297_v44 = vld [vmem:[#allocation7 + $0x270] ss:$24 sps:$4 sm:$0xff]  }
  0x42   :  { %253 = vmatpush1.bf16.msra.mxu1 %v1217_v10  ;;  %v1301_v45 = vld [vmem:[#allocation7 + $0x244] ss:$24 sps:$4 sm:$0xff]   ;;  %v1303_v46 = vld [vmem:[#allocation7 + $0x240] ss:$24 sps:$4 sm:$0xff]   ;;  %v1307_v47 = vld [vmem:[#allocation7 + $0x214] ss:$24 sps:$4 sm:$0xff]  }
  0x43   :  { %254 = vmatprep.subr.bf16.mxu1 %v1222_v11  ;;  %v1309_v48 = vld [vmem:[#allocation7 + $0x210] ss:$24 sps:$4 sm:$0xff]   ;;  %v1313_v49 = vld [vmem:[#allocation7 + $0x1e4] ss:$24 sps:$4 sm:$0xff]   ;;  %v1315_v50 = vld [vmem:[#allocation7 + $0x1e0] ss:$24 sps:$4 sm:$0xff]  }
  0x44   :  { %910 = vmatpush1.bf16.msra.mxu0 %v1249_v28  ;;  %v1076_v51 = vld [vmem:[%s1580_s2] ss:$0 sm:$0xff]  ;;  %v1246_v61 = vld [vmem:[#allocation7 + $0x12c] ss:$24 sps:$4 sm:$0xff]   ;;  %v1244_v62 = vld [vmem:[#allocation7 + $0x128] ss:$24 sps:$4 sm:$0xff]  }
  0x45   :  { %911 = vmatprep.subr.bf16.mxu0 %v1253_v29  ;;  %v1238_v58 = vld [vmem:[#allocation7 + $0x158] ss:$24 sps:$4 sm:$0xff]   ;;  %v1252_v63 = vld [vmem:[#allocation7 + $0xfc] ss:$24 sps:$4 sm:$0xff]   ;;  %v1258_v1 = vld [vmem:[#allocation7 + $0xcc] ss:$24 sps:$4 sm:$0xff]  }
  0x46   :  { %255 = vmatpush1.bf16.msra.mxu1 %v1220_v12  ;;  %v1250_v0 = vld [vmem:[#allocation7 + $0xf8] ss:$24 sps:$4 sm:$0xff]   ;;  %v1256_v2 = vld [vmem:[#allocation7 + $0xc8] ss:$24 sps:$4 sm:$0xff]   ;;  %v1264_v3 = vld [vmem:[#allocation7 + $0x9c] ss:$24 sps:$4 sm:$0xff]  }
  0x47   :  { %256 = vmatprep.subr.bf16.mxu1 %v1225_v13  ;;  %v1262_v4 = vld [vmem:[#allocation7 + $0x98] ss:$24 sps:$4 sm:$0xff]   ;;  %v1270_v5 = vld [vmem:[#allocation7 + $0x6c] ss:$24 sps:$4 sm:$0xff]   ;;  %v1268_v6 = vld [vmem:[#allocation7 + $0x68] ss:$24 sps:$4 sm:$0xff]  }
  0x48   :  { %912 = vmatpush1.bf16.msra.mxu0 %v1255_v30  ;;  %v1276_v7 = vld [vmem:[#allocation7 + $0x3c] ss:$24 sps:$4 sm:$0xff]   ;;  %v1274_v8 = vld [vmem:[#allocation7 + $0x38] ss:$24 sps:$4 sm:$0xff]   ;;  %v1282_v9 = vld [vmem:[#allocation7 + $0xc] ss:$24 sps:$4 sm:$0xff]  }
  0x49   :  { %913 = vmatprep.subr.bf16.mxu0 %v1259_v31  ;;  %v1280_v10 = vld [vmem:[#allocation7 + $0x8] ss:$24 sps:$4 sm:$0xff]   ;;  %v1288_v11 = vld [vmem:[#allocation7 + $0x2dc] ss:$24 sps:$4 sm:$0xff]   ;;  %v1286_v12 = vld [vmem:[#allocation7 + $0x2d8] ss:$24 sps:$4 sm:$0xff]  }
  0x4a   :  { %257 = vmatpush1.bf16.msra.mxu1 %v1223_v14  ;;  %v1294_v13 = vld [vmem:[#allocation7 + $0x2ac] ss:$24 sps:$4 sm:$0xff]   ;;  %v1292_v14 = vld [vmem:[#allocation7 + $0x2a8] ss:$24 sps:$4 sm:$0xff]   ;;  %v1324_v25 = vld [vmem:[#allocation7 + $0x1bc] ss:$24 sps:$4 sm:$0xff]  }
  0x4b   :  { %258 = vmatprep.subr.bf16.mxu1 %v1228_v15  ;;  %v1300_v15 = vld [vmem:[#allocation7 + $0x27c] ss:$24 sps:$4 sm:$0xff]   ;;  %v1318_v21 = vld [vmem:[#allocation7 + $0x1ec] ss:$24 sps:$4 sm:$0xff]   ;;  %v1316_v22 = vld [vmem:[#allocation7 + $0x1e8] ss:$24 sps:$4 sm:$0xff]  }
  0x4c   :  { %914 = vmatpush1.bf16.msra.mxu0 %v1261_v32  ;;  %v1319_v23 = vld [vmem:[#allocation7 + $0x1b4] ss:$24 sps:$4 sm:$0xff]   ;;  %v1322_v26 = vld [vmem:[#allocation7 + $0x1b8] ss:$24 sps:$4 sm:$0xff]   ;;  %v1325_v27 = vld [vmem:[#allocation7 + $0x184] ss:$24 sps:$4 sm:$0xff]   ;;  %v158_v32 = vlaneseq }
  0x4d   :  { %915 = vmatprep.subr.bf16.mxu0 %v1265_v33  ;;  %v1327_v28 = vld [vmem:[#allocation7 + $0x180] ss:$24 sps:$4 sm:$0xff]   ;;  %v1330_v29 = vld [vmem:[#allocation7 + $0x18c] ss:$24 sps:$4 sm:$0xff]  }
  0x4e   :  { %259 = vmatpush1.bf16.msra.mxu1 %v1226_v16  ;;  %v1298_v16 = vld [vmem:[#allocation7 + $0x278] ss:$24 sps:$4 sm:$0xff]   ;;  %v1328_v30 = vld [vmem:[#allocation7 + $0x188] ss:$24 sps:$4 sm:$0xff]   ;;  %v1333_v31 = vld [vmem:[#allocation7 + $0x164] ss:$24 sps:$4 sm:$0xff]  }
  0x4f   :  { %260 = vmatprep.subr.bf16.mxu1 %v1231_v17  ;;  %v1306_v17 = vld [vmem:[#allocation7 + $0x24c] ss:$24 sps:$4 sm:$0xff]   ;;  %v1544_v33 = vshrl.u32 %v158_v32, 7 }
  0x50   :  { %916 = vmatpush1.bf16.msra.mxu0 %v1267_v34 }
  0x51   :  { %917 = vmatprep.subr.bf16.mxu0 %v1271_v35  ;;  %v160_v34 = vsub.s32 0, %v1544_v33  ;;  %v156_v35 = vld [vmem:[%s1582_s4] sm:$0x3] }
  0x52   :  { %261 = vmatpush1.bf16.msra.mxu1 %v1229_v18  ;;  %v1304_v18 = vld [vmem:[#allocation7 + $0x248] ss:$24 sps:$4 sm:$0xff]  }
  0x53   :  { %262 = vmatprep.subr.bf16.mxu1 %v1234_v19  ;;  %v1312_v19 = vld [vmem:[#allocation7 + $0x21c] ss:$24 sps:$4 sm:$0xff]  }
  0x54   :  { %918 = vmatpush1.bf16.msra.mxu0 %v1273_v36  ;;  %v164_v36 = vsub.s32 1, %v1544_v33 }
  0x55   :  { %919 = vmatprep.subr.bf16.mxu0 %v1277_v37  ;;  %v161_v37 = vrot.slane %v156_v35, %v160_v34 }
  0x56   :  { %263 = vmatpush1.bf16.msra.mxu1 %v1232_v20  ;;  %v1310_v20 = vld [vmem:[#allocation7 + $0x218] ss:$24 sps:$4 sm:$0xff]  }
  0x57   :  { %946 = vmatprep.subr.bf16.mxu1 %v1240_v24  ;;  %v1321_v24 = vld [vmem:[#allocation7 + $0x1b0] ss:$24 sps:$4 sm:$0xff]  }
  0x58   :  { %920 = vmatpush1.bf16.msra.mxu0 %v1279_v38  ;;  %v165_v38 = vrot.slane %v156_v35, %v164_v36 }
  0x59   :  { %921 = vmatprep.subr.bf16.mxu0 %v1283_v39 }
  0x5c   :  { %922 = vmatpush2.bf16.msra.mxu0 %v1285_v40 }
  0x5d   :  { %923 = vmatprep.subr.bf16.mxu0 %v1289_v41 }
  0x60   :  { %924 = vmatpush2.bf16.msra.mxu0 %v1291_v42 }
  0x61   :  { %925 = vmatprep.subr.bf16.mxu0 %v1295_v43 }
  0x64   :  { %926 = vmatpush2.bf16.msra.mxu0 %v1297_v44 }
  0x65   :  { %927 = vmatprep.subr.bf16.mxu0 %v1301_v45 }
  0x68   :  { %928 = vmatpush2.bf16.msra.mxu0 %v1303_v46 }
  0x69   :  { %929 = vmatprep.subr.bf16.mxu0 %v1307_v47 }
  0x6c   :  { %930 = vmatpush2.bf16.msra.mxu0 %v1309_v48 }
  0x6d   :  { %931 = vmatprep.subr.bf16.mxu0 %v1313_v49 }
  0x70   :  { %932 = vmatpush2.bf16.msra.mxu0 %v1315_v50  ;;  %v1331_v50 = vld [vmem:[#allocation7 + $0x160] ss:$24 sps:$4 sm:$0xff]  }
  0x71   :  { %933 = vmatprep.subr.bf16.mxu0 %v1319_v23 }
  0x74   :  { %934 = vmatpush2.bf16.msra.mxu0 %v1321_v24 }
  0x75   :  { %935 = vmatprep.subr.bf16.mxu0 %v1325_v27 }
  0x78   :  { %936 = vmatpush2.bf16.msra.mxu0 %v1327_v28 }
  0x79   :  { %987 = vmatprep.subr.bf16.mxu0 %v1333_v31 }
  0xf9   :  { %v130_v52 = vpop.f32.mrf.mxu1 }
  0xfa   :  { %v131_v53 = vadd.f32 %v1076_v51, %v130_v52  ;;  %v1336_v52 = vld [vmem:[#allocation7 + $0x134] ss:$24 sps:$4 sm:$0xff]  }
  0xfb   :  { %v1197_v54 = vpop.f32.mrf.mxu1 }
  0xfc   :  { %vm136_vm3 = vcmp.gt.f32.partialorder %v131_v53, 0.0  ;;  %v137_v55 = vmul.f32 0.2, %v131_v53  ;;  %v1339_v54 = vld [vmem:[#allocation7 + $0x104] ss:$24 sps:$4 sm:$0xff]  }
  0xfd   :  { %v133_v56 = vpop.f32.mrf.mxu1 }
  0xfe   :  { %v138_v57 = vsel %vm136_vm3, %v131_v53, %v137_v55  ;;  %v1334_v53 = vld [vmem:[#allocation7 + $0x130] ss:$24 sps:$4 sm:$0xff]   ;;  %v1337_v55 = vld [vmem:[#allocation7 + $0x100] ss:$24 sps:$4 sm:$0xff]   ;;  %v1342_v56 = vld [vmem:[#allocation7 + $0xd4] ss:$24 sps:$4 sm:$0xff]  }
  0xff   :  { %v139_v59 = vpack.c.bf16 %v138_v57, %v138_v57  ;;  %v1198_v60 = vpop.f32.mrf.mxu1  ;;  %v1340_v57 = vld [vmem:[#allocation7 + $0xd0] ss:$24 sps:$4 sm:$0xff]  }
 0x100   :  { %v1348_v60 = vld [vmem:[#allocation7 + $0x74] ss:$24 sps:$4 sm:$0xff]  }
 0x101   :  { %281 = vmatmul.mubr.bf16.vlgmr.msra.gmra.mxu1 %v139_v59  ;;  %v1343_v59 = vld [vmem:[#allocation7 + $0xa0] ss:$24 sps:$4 sm:$0xff]  }
 0x102   :  { %947 = vmatpush1.bf16.msra.mxu1 %v1238_v58  ;;  %v1345_v58 = vld [vmem:[#allocation7 + $0xa4] ss:$24 sps:$4 sm:$0xff]  }
 0x103   :  { %948 = vmatprep.subr.bf16.mxu1 %v1246_v61  ;;  %v1346_v61 = vld [vmem:[#allocation7 + $0x70] ss:$24 sps:$4 sm:$0xff]  }
 0x106   :  { %949 = vmatpush1.bf16.msra.mxu1 %v1244_v62  ;;  %v1351_v62 = vld [vmem:[#allocation7 + $0x44] ss:$24 sps:$4 sm:$0xff]  }
 0x107   :  { %950 = vmatprep.subr.bf16.mxu1 %v1252_v63  ;;  %v1349_v63 = vld [vmem:[#allocation7 + $0x40] ss:$24 sps:$4 sm:$0xff]  }
 0x10a   :  { %951 = vmatpush1.bf16.msra.mxu1 %v1250_v0  ;;  %v1354_v0 = vld [vmem:[#allocation7 + $0x14] ss:$24 sps:$4 sm:$0xff]  }
 0x10b   :  { %952 = vmatprep.subr.bf16.mxu1 %v1258_v1  ;;  %v1352_v1 = vld [vmem:[#allocation7 + $0x10] ss:$24 sps:$4 sm:$0xff]  }
 0x10e   :  { %953 = vmatpush1.bf16.msra.mxu1 %v1256_v2  ;;  %v1357_v2 = vld [vmem:[#allocation7 + $0x2e4] ss:$24 sps:$4 sm:$0xff]  }
 0x10f   :  { %954 = vmatprep.subr.bf16.mxu1 %v1264_v3  ;;  %v1355_v3 = vld [vmem:[#allocation7 + $0x2e0] ss:$24 sps:$4 sm:$0xff]  }
 0x112   :  { %955 = vmatpush1.bf16.msra.mxu1 %v1262_v4  ;;  %v1360_v4 = vld [vmem:[#allocation7 + $0x2b4] ss:$24 sps:$4 sm:$0xff]  }
 0x113   :  { %956 = vmatprep.subr.bf16.mxu1 %v1270_v5  ;;  %v1358_v5 = vld [vmem:[#allocation7 + $0x2b0] ss:$24 sps:$4 sm:$0xff]  }
 0x116   :  { %957 = vmatpush1.bf16.msra.mxu1 %v1268_v6  ;;  %v1363_v6 = vld [vmem:[#allocation7 + $0x284] ss:$24 sps:$4 sm:$0xff]  }
 0x117   :  { %958 = vmatprep.subr.bf16.mxu1 %v1276_v7  ;;  %v1361_v7 = vld [vmem:[#allocation7 + $0x280] ss:$24 sps:$4 sm:$0xff]  }
 0x11a   :  { %959 = vmatpush1.bf16.msra.mxu1 %v1274_v8  ;;  %v1366_v8 = vld [vmem:[#allocation7 + $0x254] ss:$24 sps:$4 sm:$0xff]  }
 0x11b   :  { %960 = vmatprep.subr.bf16.mxu1 %v1282_v9  ;;  %v1364_v9 = vld [vmem:[#allocation7 + $0x250] ss:$24 sps:$4 sm:$0xff]  }
 0x11e   :  { %961 = vmatpush1.bf16.msra.mxu1 %v1280_v10  ;;  %v1369_v10 = vld [vmem:[#allocation7 + $0x224] ss:$24 sps:$4 sm:$0xff]  }
 0x11f   :  { %962 = vmatprep.subr.bf16.mxu1 %v1288_v11  ;;  %v1367_v11 = vld [vmem:[#allocation7 + $0x220] ss:$24 sps:$4 sm:$0xff]  }
 0x122   :  { %963 = vmatpush2.bf16.msra.mxu1 %v1286_v12  ;;  %v1372_v12 = vld [vmem:[#allocation7 + $0x1f4] ss:$24 sps:$4 sm:$0xff]  }
 0x123   :  { %964 = vmatprep.subr.bf16.mxu1 %v1294_v13  ;;  %v1370_v13 = vld [vmem:[#allocation7 + $0x1f0] ss:$24 sps:$4 sm:$0xff]  }
 0x126   :  { %965 = vmatpush2.bf16.msra.mxu1 %v1292_v14  ;;  %v1375_v14 = vld [vmem:[#allocation7 + $0x1c4] ss:$24 sps:$4 sm:$0xff]  }
 0x127   :  { %966 = vmatprep.subr.bf16.mxu1 %v1300_v15  ;;  %v1373_v15 = vld [vmem:[#allocation7 + $0x1c0] ss:$24 sps:$4 sm:$0xff]  }
 0x12a   :  { %967 = vmatpush2.bf16.msra.mxu1 %v1298_v16  ;;  %v1378_v16 = vld [vmem:[#allocation7 + $0x194] ss:$24 sps:$4 sm:$0xff]  }
 0x12b   :  { %968 = vmatprep.subr.bf16.mxu1 %v1306_v17  ;;  %v1376_v17 = vld [vmem:[#allocation7 + $0x190] ss:$24 sps:$4 sm:$0xff]  }
 0x12e   :  { %969 = vmatpush2.bf16.msra.mxu1 %v1304_v18  ;;  %v405_v18 = vsub.s32 2, %v1544_v33 }
 0x12f   :  { %970 = vmatprep.subr.bf16.mxu1 %v1312_v19  ;;  %v393_v19 = vld [vmem:[%s1584_s6] sm:$0x3f] }
 0x130   :  { %v402_v23 = vrot.slane %v393_v19, %v164_v36 }
 0x132   :  { %971 = vmatpush2.bf16.msra.mxu1 %v1310_v20  ;;  %v409_v20 = vsub.s32 3, %v1544_v33 }
 0x133   :  { %972 = vmatprep.subr.bf16.mxu1 %v1318_v21  ;;  %v398_v21 = vrot.slane %v393_v19, %v160_v34 }
 0x134   :  { %v410_v24 = vrot.slane %v393_v19, %v409_v20 }
 0x136   :  { %973 = vmatpush2.bf16.msra.mxu1 %v1316_v22  ;;  %v406_v22 = vrot.slane %v393_v19, %v405_v18 }
 0x137   :  { %974 = vmatprep.subr.bf16.mxu1 %v1324_v25 }
 0x13a   :  { %975 = vmatpush2.bf16.msra.mxu1 %v1322_v26 }
 0x13b   :  { %976 = vmatprep.subr.bf16.mxu1 %v1330_v29 }
 0x13e   :  { %977 = vmatpush2.bf16.msra.mxu1 %v1328_v30 }
 0x1c1   :  { %v282_v39 = vpop.f32.mrf.mxu1 }
 0x1c2   :  { %v283_v40 = vadd.f32 %v282_v39, %v161_v37  ;;  %v1488_v39 = vmov 1983009808  }
 0x1c3   :  { %v284_v41 = vpop.f32.mrf.mxu1 }
 0x1c4   :  { %vm289_vm4 = vcmp.gt.f32.partialorder %v283_v40, 0.0  ;;  %v291_v42 = vmul.f32 0.2, %v283_v40  ;;  %v285_v43 = vadd.f32 %v284_v41, %v165_v38 }
 0x1c5   :  { %v286_v44 = vpop.f32.mrf.mxu1 }
 0x1c6   :  { %vm290_vm5 = vcmp.gt.f32.partialorder %v285_v43, 0.0  ;;  %v292_v45 = vmul.f32 0.2, %v285_v43  ;;  %v293_v47 = vsel %vm289_vm4, %v283_v40, %v291_v42  ;;  %v1043_v40 = vunpack.c.l.s4 %v1488_v39 }
 0x1c7   :  { %v287_v46 = vpop.f32.mrf.mxu1  ;;  %v1555_v51 = vpack.c.bf16 %v293_v47, %v293_v47 }
 0x1c8   :  { %v294_v48 = vsel %vm290_vm5, %v285_v43, %v292_v45  ;;  %v1044_v36 = vunpack.c.0.s8 %v1043_v40 }
 0x1c9   :  { %v296_v49 = vpack.c.bf16 %v294_v48, %v294_v48 }
 0x1ca   :  { %v1047_v43 = vsub.s32 %v1044_v36, %v1544_v33 }
 0x1cb   :  { %937 = vmatprep.mubr.bf16.mxu0 %v296_v49  ;;  %978 = vmatprep.mubr.bf16.mxu1 %v296_v49 }
 0x1cc   :  { %938 = vmatmul.mubr.bf16.vlgmr.msra.gmra.mxu0 %v1555_v51  ;;  %979 = vmatmul.mubr.bf16.vlgmr.msra.gmra.mxu1 %v1555_v51 }
 0x1cd   :  { %988 = vmatpush1.bf16.msra.mxu0 %v1331_v50  ;;  %1019 = vmatprep.mubr.bf16.mxu0 %v296_v49 }
 0x1ce   :  { %989 = vmatprep.subr.bf16.mxu0 %v1336_v52  ;;  %v417_v52 = vsub.s32 5, %v1544_v33 }
 0x1d1   :  { %990 = vmatpush1.bf16.msra.mxu0 %v1334_v53 }
 0x1d2   :  { %991 = vmatprep.subr.bf16.mxu0 %v1339_v54  ;;  %v418_v54 = vrot.slane %v393_v19, %v417_v52 }
 0x1d5   :  { %992 = vmatpush1.bf16.msra.mxu0 %v1337_v55 }
 0x1d6   :  { %993 = vmatprep.subr.bf16.mxu0 %v1342_v56 }
 0x1d9   :  { %994 = vmatpush1.bf16.msra.mxu0 %v1340_v57 }
 0x1da   :  { %995 = vmatprep.subr.bf16.mxu0 %v1345_v58 }
 0x1dd   :  { %996 = vmatpush1.bf16.msra.mxu0 %v1343_v59 }
 0x1de   :  { %997 = vmatprep.subr.bf16.mxu0 %v1348_v60 }
 0x1e1   :  { %998 = vmatpush1.bf16.msra.mxu0 %v1346_v61 }
 0x1e2   :  { %999 = vmatprep.subr.bf16.mxu0 %v1351_v62 }
 0x1e5   :  { %1000 = vmatpush1.bf16.msra.mxu0 %v1349_v63 }
 0x1e6   :  { %1001 = vmatprep.subr.bf16.mxu0 %v1354_v0 }
 0x1e9   :  { %1002 = vmatpush1.bf16.msra.mxu0 %v1352_v1 }
 0x1ea   :  { %1003 = vmatprep.subr.bf16.mxu0 %v1357_v2 }
 0x1ed   :  { %1004 = vmatpush2.bf16.msra.mxu0 %v1355_v3 }
 0x1ee   :  { %1005 = vmatprep.subr.bf16.mxu0 %v1360_v4 }
 0x1f1   :  { %1006 = vmatpush2.bf16.msra.mxu0 %v1358_v5 }
 0x1f2   :  { %1007 = vmatprep.subr.bf16.mxu0 %v1363_v6 }
 0x1f5   :  { %1008 = vmatpush2.bf16.msra.mxu0 %v1361_v7 }
 0x1f6   :  { %1009 = vmatprep.subr.bf16.mxu0 %v1366_v8 }
 0x1f9   :  { %1010 = vmatpush2.bf16.msra.mxu0 %v1364_v9 }
 0x1fa   :  { %1011 = vmatprep.subr.bf16.mxu0 %v1369_v10 }
 0x1fd   :  { %1012 = vmatpush2.bf16.msra.mxu0 %v1367_v11 }
 0x1fe   :  { %1013 = vmatprep.subr.bf16.mxu0 %v1372_v12 }
 0x201   :  { %1014 = vmatpush2.bf16.msra.mxu0 %v1370_v13 }
 0x202   :  { %1015 = vmatprep.subr.bf16.mxu0 %v1375_v14 }
 0x205   :  { %1016 = vmatpush2.bf16.msra.mxu0 %v1373_v15 }
 0x206   :  { %1017 = vmatprep.subr.bf16.mxu0 %v1378_v16 }
 0x209   :  { %1018 = vmatpush2.bf16.msra.mxu0 %v1376_v17 }
 0x20c   :  { %1020 = vmatmul.mubr.bf16.vlgmr.msra.gmra.mxu0 %v1555_v51  ;;  %v413_v51 = vsub.s32 4, %v1544_v33 }
 0x20e   :  { %v414_v53 = vrot.slane %v393_v19, %v413_v51 }
 0x28c   :  { %v939_v25 = vpop.f32.mrf.mxu0  ;;  %v980_v26 = vpop.f32.mrf.mxu1 }
 0x28d   :  { %v940_v27 = vadd.f32 %v939_v25, %v398_v21  ;;  %v981_v28 = vadd.f32 %v980_v26, %v406_v22 }
 0x28e   :  { %v941_v29 = vpop.f32.mrf.mxu0  ;;  %v982_v30 = vpop.f32.mrf.mxu1 }
 0x28f   :  { %1379 = vtanh.f32 %v940_v27  ;;  %v942_v31 = vadd.f32 %v941_v29, %v402_v23  ;;  %v983_v32 = vadd.f32 %v982_v30, %v410_v24 }
 0x290   :  { %1381 = vtanh.f32 %v981_v28  ;;  %v943_v35 = vpop.f32.mrf.mxu0  ;;  %v984_v37 = vpop.f32.mrf.mxu1 }
 0x291   :  { %1383 = vtanh.f32 %v942_v31 }
 0x292   :  { %1385 = vtanh.f32 %v983_v32  ;;  %v944_v34 = vpop.f32.mrf.mxu0  ;;  %v985_v38 = vpop.f32.mrf.mxu1 }
 0x29c   :  { %v1380_v41 = vpop.eup %1379 }
 0x29d   :  { %v1382_v42 = vpop.eup %1381 }
 0x29e   :  { %v1384_v44 = vpop.eup %1383 }
 0x29f   :  { %v1386_v45 = vpop.eup %1385  ;;  %v1040_v46 = vcombine.low %v1380_v41, %v1384_v44 }
 0x2a0   :  { %v1041_v47 = vcombine.low %v1382_v42, %v1386_v45 }
 0x2a1   :  { %v1048_v48 = vrot.slane %v1040_v46, %v1047_v43 }
 0x2a2   :  { %v1055_v49 = vrot.slane %v1041_v47, %v1047_v43 }
 0x2a4   :  { %v1056_v50 = vcombine.low %v1048_v48, %v1055_v49 }
 0x2a6   :  { %1067 = vst [vmem:[%s1585_s7] sm:$0xff] %v1056_v50 }
 0x2cc   :  { %v1021_v55 = vpop.f32.mrf.mxu0 }
 0x2cd   :  { %v1022_v56 = vadd.f32 %v1021_v55, %v414_v53 }
 0x2ce   :  { %v1023_v57 = vpop.f32.mrf.mxu0 }
 0x2cf   :  { %v1024_v58 = vadd.f32 %v1023_v57, %v418_v54  ;;  %1387 = vtanh.f32 %v1022_v56 }
 0x2d0   :  { %v1025_v59 = vpop.f32.mrf.mxu0 }
 0x2d1   :  { %1389 = vtanh.f32 %v1024_v58 }
 0x2d2   :  { %v1026_v60 = vpop.f32.mrf.mxu0 }
 0x2dc   :  { %v1388_v61 = vpop.eup %1387 }
 0x2de   :  { %v1390_v62 = vpop.eup %1389 }
 0x2df   :  { %v1057_v63 = vcombine.low %v1388_v61, %v1390_v62 }
 0x2e1   :  { %1190 = vst.sshfl [vmem:[%s1585_s7 + $0x8] sm:$0x33 pattern:$0x76325410] %v1057_v63 }
 0x2e2   :  { %1073 = vsyncpa [#allocation3], 1 }
 0x2e3   :  { %1074 = vsyncpa [#allocation5], 1 }
 0x2e4   :  { %1075 = vsyncpa [#allocation8], 1 }

</bundles_post_ra>
